<compile_context>
chip_gen: v7x
topology: tpu7x:2x2x1
jax: 0.10.0
libtpu: 0.0.40
codegen_flags: <defaults>
</compile_context>

<pallas_src>
import math

import jax
import jax.numpy as jnp
from jax.experimental import pallas as pl
from jax.experimental.pallas import tpu as pltpu


# --------------------------------------------------------------------------- #
# Kernel
# --------------------------------------------------------------------------- #
def _pos_enc_add_kernel(x_ref, pe_ref, o_ref):
    # x_ref : (TB, TILE_S, Dk) tile of x
    # pe_ref: (TB, 1,      Dk) positional-encoding rows for those batch indices
    # o_ref : (TB, TILE_S, Dk)
    # Pure HBM-streaming broadcast-add; the add happens in the promoted dtype.
    o_ref[...] = x_ref[...].astype(o_ref.dtype) + pe_ref[...]


# --------------------------------------------------------------------------- #
# pe table construction (identical math to the PyTorch __init__)
# --------------------------------------------------------------------------- #
def make_pe_table(d_model: int, max_len: int = 5000) -> jnp.ndarray:
    position = jnp.arange(max_len, dtype=jnp.float32)[:, None]          # (max_len, 1)
    div_term = jnp.exp(
        jnp.arange(0, d_model, 2, dtype=jnp.float32) * (-math.log(10000.0) / d_model)
    )                                                                    # (d_model//2,)
    pe = jnp.zeros((max_len, 1, d_model), dtype=jnp.float32)
    pe = pe.at[:, 0, 0::2].set(jnp.sin(position * div_term))
    pe = pe.at[:, 0, 1::2].set(jnp.cos(position * div_term))
    return pe


# --------------------------------------------------------------------------- #
# Tiling heuristics (all plain Python ints, evaluated at trace time)
# --------------------------------------------------------------------------- #
def _ceil_div(a: int, b: int) -> int:
    return -(-a // b)


def _choose_lane_fold(S: int, D: int, max_lane_width: int = 4096) -> int:
    """Largest G dividing S with (G*D) % 128 == 0 and G*D <= max_lane_width."""
    if D % 128 == 0 or D > max_lane_width:
        return 1
    best, g = 1, 1
    while g <= S and g * D <= max_lane_width:
        if S % g == 0 and (g * D) % 128 == 0:
            best = g
        g += 1
    return best


def _vmem_budget():
    """Generation-aware (vmem_limit_bytes, max_tile_bytes)."""
    cap = None
    try:
        info = pltpu.get_tpu_info()
        cap = getattr(info, "vmem_capacity_bytes", None)
    except Exception:
        cap = None
    if not cap:
        cap = 64 << 20                      # conservative: v7x per-TC physical VMEM
    vmem_limit = int(min(cap // 2, 64 << 20))          # 32 MiB v7x, 64 MiB v5e/v6e
    # double-buffered x + out = 4x tile, plus pe + headroom  ->  ~limit/5 per tile
    max_tile_bytes = int(min(max(vmem_limit // 5, 4 << 20), 12 << 20))
    return vmem_limit, max_tile_bytes


def _choose_tiles(B: int, S_k: int, D_k: int, itemsize: int, max_tile_bytes: int):
    """Pick (batch block, seq tile).  Seq tile is a multiple of 8 or the full dim."""
    row_bytes = D_k * itemsize
    slab_bytes = S_k * row_bytes
    if slab_bytes <= max_tile_bytes:
        # Whole seq slab fits: fold several batch rows to keep tiles multi-MiB.
        tile_s = S_k
        tile_b = max(1, min(B, max_tile_bytes // max(slab_bytes, 1)))
    else:
        tile_b = 1
        tile_s = (max_tile_bytes // row_bytes) // 8 * 8
        if tile_s < 8 or S_k <= 8:
            tile_s = S_k                    # full dim is always layout-legal
        else:
            tile_s = min(tile_s, S_k)

    # v7x megacore: make sure the parallel grid has >= 2 steps when possible.
    if _ceil_div(B, tile_b) * _ceil_div(S_k, tile_s) < 2:
        if B >= 2:
            tile_b = _ceil_div(B, 2)
        elif S_k >= 16:
            tile_s = min(S_k, max(8, _ceil_div(_ceil_div(S_k, 2), 8) * 8))
    return tile_b, tile_s


# --------------------------------------------------------------------------- #
# Forward
# --------------------------------------------------------------------------- #
def positional_encoding_forward(x: jnp.ndarray, pe: jnp.ndarray) -> jnp.ndarray:
    """x: (B, S, D).  pe: (max_len, 1, D).  Returns x + pe[:B] (torch-promoted dtype)."""
    B, S, D = x.shape
    out_dtype = jnp.result_type(x.dtype, pe.dtype)     # torch promotion (pe is fp32)
    itemsize = max(jnp.dtype(x.dtype).itemsize, jnp.dtype(out_dtype).itemsize)

    # Tiny, constant-foldable under jit; precompute once per model in practice.
    pe_slice = pe[:B].astype(out_dtype)                 # (B, 1, D)

    # --- lane densification: present a last dim that is a multiple of 128 ----
    G = _choose_lane_fold(S, D)
    if G > 1:
        S_k, D_k = S // G, G * D
        x_k = x.reshape(B, S_k, D_k)                    # contiguous minor-dim merge
        pe_k = jnp.tile(pe_slice, (1, 1, G))            # (B, 1, G*D), tiny
    else:
        S_k, D_k = S, D
        x_k = x
        pe_k = pe_slice

    # --- generation-aware tiling ---------------------------------------------
    vmem_limit, max_tile_bytes = _vmem_budget()
    TB, TS = _choose_tiles(B, S_k, D_k, itemsize, max_tile_bytes)
    grid = (pl.cdiv(B, TB), pl.cdiv(S_k, TS))

    out = pl.pallas_call(
        _pos_enc_add_kernel,
        out_shape=jax.ShapeDtypeStruct((B, S_k, D_k), out_dtype),
        grid_spec=pltpu.PrefetchScalarGridSpec(
            num_scalar_prefetch=0,
            grid=grid,
            in_specs=[
                pl.BlockSpec((TB, TS, D_k), lambda b, s: (b, s, 0)),
                # pe block index is constant along the seq axis -> stays
                # VMEM-resident across the inner grid axis (no re-DMA).
                pl.BlockSpec((TB, 1, D_k), lambda b, s: (b, 0, 0)),
            ],
            out_specs=pl.BlockSpec((TB, TS, D_k), lambda b, s: (b, s, 0)),
        ),
        compiler_params=pltpu.CompilerParams(
            dimension_semantics=("parallel", "parallel"),
            vmem_limit_bytes=vmem_limit,
        ),
        cost_estimate=pl.CostEstimate(
            flops=B * S * D,
            transcendentals=0,
            bytes_accessed=B * S * D * (jnp.dtype(x.dtype).itemsize
                                        + jnp.dtype(out_dtype).itemsize)
                           + B * D * jnp.dtype(out_dtype).itemsize,
        ),
    )(x_k, pe_k)

    return out.reshape(B, S, D)


# --------------------------------------------------------------------------- #
# Demo / correctness check
# --------------------------------------------------------------------------- #
if __name__ == "__main__":
    B, S, D = 2, 8, 32
    key = jax.random.PRNGKey(0)
    x = jax.random.normal(key, (B, S, D), dtype=jnp.float32)

    pe = make_pe_table(d_model=D, max_len=5000)

    fwd = jax.jit(positional_encoding_forward)
    out = jax.block_until_ready(fwd(x, pe))

    # Reference (plain JAX, same math as the PyTorch forward: x + pe[:B])
    ref = x + pe[:B]
    assert out.shape == ref.shape, (out.shape, ref.shape)
    assert out.dtype == ref.dtype, (out.dtype, ref.dtype)
    assert jnp.allclose(out, ref, atol=1e-6, rtol=1e-6), "mismatch vs reference"

    print("KERNEL_OK")
</pallas_src>

<mosaic_0001>
module attributes {stable_mosaic.version = 11 : i64} {
  func.func @_pos_enc_add_kernel(%arg0: i32, %arg1: i32, %arg2: memref<1x1x256xf32, #tpu.memory_space<vmem>>, %arg3: memref<1x1x256xf32, #tpu.memory_space<vmem>>, %arg4: memref<1x1x256xf32, #tpu.memory_space<vmem>>) attributes {dimension_semantics = [#tpu.dimension_semantics<parallel>, #tpu.dimension_semantics<parallel>], iteration_bounds = array<i64: 2, 1>, scalar_prefetch = 0 : i64, scratch_operands = 0 : i64, tpu.core_type = #tpu.core_type<tc>, window_params = [{transform_indices = @transform_0, window_bounds = array<i64: 1, 1, 256>}, {transform_indices = @transform_1, window_bounds = array<i64: 1, 1, 256>}, {transform_indices = @transform_2, window_bounds = array<i64: 1, 1, 256>}]} {
    %c0 = arith.constant 0 : index
    %c0_0 = arith.constant 0 : index
    %c0_1 = arith.constant 0 : index
    %0 = vector.load %arg2[%c0, %c0_0, %c0_1] : memref<1x1x256xf32, #tpu.memory_space<vmem>>, vector<1x1x256xf32>
    %c0_2 = arith.constant 0 : index
    %c0_3 = arith.constant 0 : index
    %c0_4 = arith.constant 0 : index
    %1 = vector.load %arg3[%c0_2, %c0_3, %c0_4] : memref<1x1x256xf32, #tpu.memory_space<vmem>>, vector<1x1x256xf32>
    %2 = arith.addf %0, %1 : vector<1x1x256xf32>
    %c0_5 = arith.constant 0 : index
    %c0_6 = arith.constant 0 : index
    %c0_7 = arith.constant 0 : index
    %3 = vector.load %arg4[%c0_5, %c0_6, %c0_7] : memref<1x1x256xf32, #tpu.memory_space<vmem>>, vector<1x1x256xf32>
    tpu.vector_store %arg4[%c0_5, %c0_6, %c0_7], %2 {strides = array<i32>} : memref<1x1x256xf32, #tpu.memory_space<vmem>>, vector<1x1x256xf32>,
    return
  }
  func.func @transform_0(%arg0: i32, %arg1: i32) -> (i32, i32, i32) {
    %c0_i32 = arith.constant 0 : i32
    %c0_i32_0 = arith.constant 0 : i32
    return %arg0, %arg1, %c0_i32 : i32, i32, i32
  }
  func.func @transform_1(%arg0: i32, %arg1: i32) -> (i32, i32, i32) {
    %c0_i32 = arith.constant 0 : i32
    %c0_i32_0 = arith.constant 0 : i32
    %c0_i32_1 = arith.constant 0 : i32
    return %arg0, %c0_i32, %c0_i32_0 : i32, i32, i32
  }
  func.func @transform_2(%arg0: i32, %arg1: i32) -> (i32, i32, i32) {
    %c0_i32 = arith.constant 0 : i32
    %c0_i32_0 = arith.constant 0 : i32
    return %arg0, %arg1, %c0_i32 : i32, i32, i32
  }
}

</mosaic_0001>

<bundles_post_ra>
// kernel: positional_encoding_forward.1
= control target key start
LH: loop header
LB: loop body
LE: loop exit
PB: predicated region body
PF: predicated region fallthrough
CT: control target
= control target key end

     0   :  { %s368_s9 = smov 0   ;;  %s370_s10 = smov 0   ;;  %s392_s0 = inlined_call_operand.vmem [shape: f32[2,1,256], index: 0, kind: input, shape index: {}]   ;;  %s393_s1 = inlined_call_operand.vmem [shape: f32[2,1,256], index: 1, kind: input, shape index: {}]   ;;  %s394_s2 = inlined_call_operand.vmem [shape: f32[2,1,256], index: 2, kind: output, shape index: {}]  }
   0x1   :  { %s372_s11 = smov 0  }
   0x2 LB: > { %s24_s12 = sadd.s32 1, %s347_s10  ;;  %p299_p0 = scmp.ge.s32.totalorder %s351_s11, 1  ;;  %s351_s11 = sphi %s372_s11, %s12_s11   ;;  %s347_s10 = sphi %s370_s10, %s396_s10   ;;  %s343_s9 = sphi %s368_s9, %s395_s9  }
   0x3   : > { %p26_p1 = scmp.ge.s32.totalorder %s24_s12, 2  ;;  %p140_p2 = scmp.lt.s32.totalorder %s351_s11, 3 }
   0x5   : > { %s398_s12 = smov (%p26_p1, %s24_s12), 0  ;;  %p141_p3 = pnand %p299_p0, %p140_p2 }
   0x6   : > { %p172_p4 = scmp.lt.s32.totalorder (!%p141_p3), %s343_s9, 1  ;;  %v195_v0 = vlaneseq (!%p141_p3) }
   0x7   : > { %144 = sbr.rel (%p141_p3) target bundleno = 22 (0x16), region = 28 }
   0x8   : > { %vm197_vm0 = vcmp.lt.s32.totalorder (!%p141_p3), %v195_v0, 256 }
   0xe   : > { %s400_s9 = smov (!%p172_p4, %s343_s9), 1 }
   0xf   : > { %s300_s13 = sshll.u32 %s400_s9, 1 }
  0x10   : > { %s179_s16 = scalar_lea.vmem %s392_s0, %s300_s13  ;;  %s183_s19 = scalar_lea.vmem %s393_s1, %s300_s13 }
  0x11   : > { %s191_s22 = scalar_lea.vmem %s394_s2, %s300_s13  ;;  %v192_v1 = vld [vmem:[%s179_s16] sm:$0x3] }
  0x12   : > { %v193_v2 = vld [vmem:[%s183_s19] sm:$0x3] }
  0x13   : > { %v194_v3 = vadd.f32 %v193_v2, %v192_v1 }
  0x15   : > { %199 = vst.msk [vmem:[%s191_s22] sm:$0x3] %vm197_vm0, %v194_v3 }
  0x16 PF: > { %s12_s11 = sadd.s32 1, %s351_s11   ;;  %s395_s9 = smov %s347_s10 }
  0x17   : > { %p9_p5 = scmp.ge.s32.totalorder %s12_s11, 4   ;;  %s396_s10 = smov %s398_s12 }
  0x19   :  { %11 = sbr.rel (!%p9_p5) target bundleno = 2 (0x2), region = 61 }

</bundles_post_ra>
